<compile_context>
chip_gen: v7x
topology: tpu7x:2x2x1
jax: 0.10.0
libtpu: 0.0.40
codegen_flags: <defaults>
</compile_context>

<pallas_src>
import functools

import jax
import jax.numpy as jnp
from jax.experimental import pallas as pl
from jax.experimental.pallas import tpu as pltpu


# ---------------------------------------------------------------------------
# Gated channel-mix kernel (shared by ContextGating and GLU).
# ---------------------------------------------------------------------------
def _gated_channel_kernel(x_ref, w_ref, b_ref, o_ref, *, gate_on_lin):
    # x_ref: (1, C, T) NCHW-native block (C on sublanes, flattened H*W on lanes)
    # w_ref: (C, C) PyTorch Linear weight, layout (out, in)
    # b_ref: (C, 1) bias column
    x = x_ref[0].astype(jnp.float32)              # (C, T)
    w = w_ref[...].astype(jnp.float32)            # (C, C)
    b = b_ref[...].astype(jnp.float32)            # (C, 1)
    C = x.shape[0]

    if C <= 32:
        # Small-channel path: unrolled VPU multiply-accumulate over input
        # channels (no MXU; channels never touch the lane axis).
        #   lin[o, t] = sum_c w[o, c] * x[c, t] + b[o]
        acc = jnp.zeros(x.shape, jnp.float32)
        for c in range(C):
            acc = acc + w[:, c:c + 1] * x[c:c + 1, :]
        lin = acc + b
    else:
        # Large-channel path: (C, C) @ (C, T) on the MXU, f32 accumulation.
        lin = jax.lax.dot_general(
            w, x, (((1,), (0,)), ((), ())),
            preferred_element_type=jnp.float32) + b

    if gate_on_lin:
        out = x * jax.nn.sigmoid(lin)             # ContextGating
    else:
        out = lin * jax.nn.sigmoid(x)             # GLU
    o_ref[0] = out.astype(o_ref.dtype)


def _pick_tile_hw(hw, c, itemsize, target_bytes=4 << 20):
    """Largest lane-tile that divides hw, is a multiple of 128 (or the whole
    hw), and keeps one (C, TILE_HW) block under ~target_bytes.  No padding is
    ever needed because the tile always divides hw exactly."""
    max_elems = max(128, target_bytes // max(1, c * itemsize))
    if hw <= max_elems:
        return hw                                  # full row: always legal
    t = (min(hw, max_elems) // 128) * 128
    while t >= 128:
        if hw % t == 0:
            return t
        t -= 128
    return hw                                      # no aligned divisor: full row


def _gated_linear_channel(x_nchw, weight, bias, *, gate_on_lin, tile_hw=None):
    """x_nchw: [N, C, H, W]; weight: [C, C] (PyTorch Linear layout, out x in);
    bias: [C].  Returns [N, C, H, W]."""
    N, C, H, W = x_nchw.shape
    HW = H * W
    itemsize = x_nchw.dtype.itemsize

    # Free, contiguous reshape (no transpose, no extra HBM traffic).
    x = x_nchw.reshape(N, C, HW)

    if tile_hw is None:
        tile_hw = _pick_tile_hw(HW, C, itemsize)
    assert HW % tile_hw == 0
    grid = (N, HW // tile_hw)

    b_col = bias.reshape(C, 1)

    # VMEM budget: double-buffered x/out tiles + (double-buffered) weight/bias.
    vmem_need = (4 * C * tile_hw + 2 * C * C + 2 * C) * itemsize
    vmem_limit = int(min(max(2 * vmem_need, 16 << 20), 48 << 20))

    cost = pl.CostEstimate(
        flops=int(2 * N * HW * C * C),
        transcendentals=int(N * HW * C),
        bytes_accessed=int((2 * N * C * HW + C * C + C) * itemsize),
    )

    kernel = functools.partial(_gated_channel_kernel, gate_on_lin=gate_on_lin)

    out = pl.pallas_call(
        kernel,
        out_shape=jax.ShapeDtypeStruct((N, C, HW), x.dtype),
        grid_spec=pltpu.PrefetchScalarGridSpec(
            num_scalar_prefetch=0,
            grid=grid,
            in_specs=[
                pl.BlockSpec((1, C, tile_hw), lambda n, j: (n, 0, j)),
                pl.BlockSpec((C, C), lambda n, j: (0, 0)),
                pl.BlockSpec((C, 1), lambda n, j: (0, 0)),
            ],
            out_specs=pl.BlockSpec((1, C, tile_hw), lambda n, j: (n, 0, j)),
        ),
        compiler_params=pltpu.CompilerParams(
            dimension_semantics=("parallel", "parallel"),
            vmem_limit_bytes=vmem_limit,
        ),
        cost_estimate=cost,
    )(x, weight, b_col)

    return out.reshape(N, C, H, W)


def context_gating(x_nchw, weight, bias, *, tile_hw=None):
    """ContextGating: x * sigmoid(Linear_over_channels(x))."""
    return _gated_linear_channel(x_nchw, weight, bias,
                                 gate_on_lin=True, tile_hw=tile_hw)


def glu(x_nchw, weight, bias, *, tile_hw=None):
    """GLU (as defined in FFD_CRNN): Linear_over_channels(x) * sigmoid(x)."""
    return _gated_linear_channel(x_nchw, weight, bias,
                                 gate_on_lin=False, tile_hw=tile_hw)


# ---------------------------------------------------------------------------
# Attention classification head (class-attention pooling over time).
# ---------------------------------------------------------------------------
def _attn_head_kernel(x_ref, wd_ref, bd_ref, ws_ref, bs_ref,
                      strong_ref, weak_ref):
    # x_ref:  (1, T, D) one batch item of BiGRU features
    # wd/ws:  (K, D) dense / dense_softmax weights; bd/bs: (1, K) biases
    x = x_ref[0].astype(jnp.float32)                      # (T, D)
    wd = wd_ref[...].astype(jnp.float32)                  # (K, D)
    bd = bd_ref[...].astype(jnp.float32)                  # (1, K)
    ws = ws_ref[...].astype(jnp.float32)
    bs = bs_ref[...].astype(jnp.float32)

    logits_d = jax.lax.dot_general(
        x, wd, (((1,), (1,)), ((), ())),
        preferred_element_type=jnp.float32) + bd          # (T, K)
    strong = jax.nn.sigmoid(logits_d)                     # (T, K)

    logits_s = jax.lax.dot_general(
        x, ws, (((1,), (1,)), ((), ())),
        preferred_element_type=jnp.float32) + bs          # (T, K)
    m = jnp.max(logits_s, axis=-1, keepdims=True)
    e = jnp.exp(logits_s - m)
    sof = e / jnp.sum(e, axis=-1, keepdims=True)          # softmax over classes
    sof = jnp.clip(sof, 1e-7, 1.0)

    weak = (jnp.sum(strong * sof, axis=0, keepdims=True) /
            jnp.sum(sof, axis=0, keepdims=True))          # (1, K)

    strong_ref[0] = strong.astype(strong_ref.dtype)
    weak_ref[0] = weak.astype(weak_ref.dtype)


def attention_head(x, w_dense, b_dense, w_soft, b_soft):
    """x: [B, T, D] BiGRU features; dense / dense_softmax params [K, D], [K].
    Returns (strong [B, K, T], weak [B, K]) matching FFD_CRNN's output."""
    B, T, D = x.shape
    K = w_dense.shape[0]
    bd = b_dense.reshape(1, K)
    bs = b_soft.reshape(1, K)

    strong, weak = pl.pallas_call(
        _attn_head_kernel,
        out_shape=(jax.ShapeDtypeStruct((B, T, K), x.dtype),
                   jax.ShapeDtypeStruct((B, 1, K), jnp.float32)),
        grid_spec=pltpu.PrefetchScalarGridSpec(
            num_scalar_prefetch=0,
            grid=(B,),
            in_specs=[
                pl.BlockSpec((1, T, D), lambda b: (b, 0, 0)),
                pl.BlockSpec((K, D), lambda b: (0, 0)),
                pl.BlockSpec((1, K), lambda b: (0, 0)),
                pl.BlockSpec((K, D), lambda b: (0, 0)),
                pl.BlockSpec((1, K), lambda b: (0, 0)),
            ],
            out_specs=[
                pl.BlockSpec((1, T, K), lambda b: (b, 0, 0)),
                pl.BlockSpec((1, 1, K), lambda b: (b, 0, 0)),
            ],
        ),
        compiler_params=pltpu.CompilerParams(
            dimension_semantics=("parallel",),
        ),
    )(x, w_dense, bd, w_soft, bs)

    # Original module returns strong.transpose(1, 2); do the cheap transpose
    # in the wrapper to keep kernel stores lane-dense.
    strong_t = jnp.transpose(strong, (0, 2, 1))           # (B, K, T)
    return strong_t, weak[:, 0, :]


if __name__ == "__main__":
    key = jax.random.PRNGKey(0)
    keys = jax.random.split(key, 8)

    # ---- ContextGating / GLU on a small NCHW feature map -------------------
    N, C, H, W = 2, 4, 16, 16
    x = jax.random.normal(keys[0], (N, C, H, W), dtype=jnp.float32)

    bound = 1.0 / (C ** 0.5)       # PyTorch-style uniform init bound
    w_cg = jax.random.uniform(keys[1], (C, C), minval=-bound, maxval=bound,
                              dtype=jnp.float32)
    b_cg = jax.random.uniform(keys[2], (C,), minval=-bound, maxval=bound,
                              dtype=jnp.float32)

    cg_out = jax.block_until_ready(context_gating(x, w_cg, b_cg))
    glu_out = jax.block_until_ready(glu(x, w_cg, b_cg))

    lin = jnp.einsum("nchw,oc->nohw", x, w_cg) + b_cg[None, :, None, None]
    cg_ref = x * jax.nn.sigmoid(lin)
    glu_ref = lin * jax.nn.sigmoid(x)
    assert cg_out.shape == (N, C, H, W)
    assert jnp.allclose(cg_out, cg_ref, atol=1e-5, rtol=1e-5)
    assert jnp.allclose(glu_out, glu_ref, atol=1e-5, rtol=1e-5)

    # ---- attention classification head on BiGRU-like features --------------
    B, T, D, K = 2, 8, 32, 10      # D = 2 * n_RNN_cell (small), K = n_class
    feats = jax.random.normal(keys[3], (B, T, D), dtype=jnp.float32)
    db = 1.0 / (D ** 0.5)
    w_d = jax.random.uniform(keys[4], (K, D), minval=-db, maxval=db,
                             dtype=jnp.float32)
    b_d = jax.random.uniform(keys[5], (K,), minval=-db, maxval=db,
                             dtype=jnp.float32)
    w_s = jax.random.uniform(keys[6], (K, D), minval=-db, maxval=db,
                             dtype=jnp.float32)
    b_s = jax.random.uniform(keys[7], (K,), minval=-db, maxval=db,
                             dtype=jnp.float32)

    strong_t, weak = attention_head(feats, w_d, b_d, w_s, b_s)
    strong_t = jax.block_until_ready(strong_t)
    weak = jax.block_until_ready(weak)

    strong_ref = jax.nn.sigmoid(feats @ w_d.T + b_d)
    sof_ref = jnp.clip(jax.nn.softmax(feats @ w_s.T + b_s, axis=-1), 1e-7, 1.0)
    weak_ref = (strong_ref * sof_ref).sum(1) / sof_ref.sum(1)
    strong_t_ref = jnp.transpose(strong_ref, (0, 2, 1))

    assert strong_t.shape == (B, K, T) and weak.shape == (B, K)
    assert jnp.allclose(strong_t, strong_t_ref, atol=2e-5, rtol=1e-5)
    assert jnp.allclose(weak, weak_ref, atol=2e-5, rtol=1e-5)

    print("KERNEL_OK")
</pallas_src>

<mosaic_0001>
module attributes {stable_mosaic.version = 11 : i64} {
  func.func @_gated_channel_kernel(%arg0: i32, %arg1: i32, %arg2: memref<1x4x256xf32, #tpu.memory_space<vmem>>, %arg3: memref<4x4xf32, #tpu.memory_space<vmem>>, %arg4: memref<4x1xf32, #tpu.memory_space<vmem>>, %arg5: memref<1x4x256xf32, #tpu.memory_space<vmem>>) attributes {dimension_semantics = [#tpu.dimension_semantics<parallel>, #tpu.dimension_semantics<parallel>], iteration_bounds = array<i64: 2, 1>, scalar_prefetch = 0 : i64, scratch_operands = 0 : i64, tpu.core_type = #tpu.core_type<tc>, window_params = [{transform_indices = @transform_0, window_bounds = array<i64: 1, 4, 256>}, {pipeline_mode = #tpu.pipeline_mode<synchronous>, transform_indices = @transform_1, window_bounds = array<i64: 4, 4>}, {pipeline_mode = #tpu.pipeline_mode<synchronous>, transform_indices = @transform_2, window_bounds = array<i64: 4, 1>}, {transform_indices = @transform_3, window_bounds = array<i64: 1, 4, 256>}]} {
    %c0 = arith.constant 0 : index
    %c0_0 = arith.constant 0 : index
    %c0_1 = arith.constant 0 : index
    %0 = vector.load %arg2[%c0, %c0_0, %c0_1] : memref<1x4x256xf32, #tpu.memory_space<vmem>>, vector<1x4x256xf32>
    %1 = vector.shape_cast %0 : vector<1x4x256xf32> to vector<4x256xf32>
    %c0_2 = arith.constant 0 : index
    %c0_3 = arith.constant 0 : index
    %2 = vector.load %arg3[%c0_2, %c0_3] : memref<4x4xf32, #tpu.memory_space<vmem>>, vector<4x4xf32>
    %c0_4 = arith.constant 0 : index
    %c0_5 = arith.constant 0 : index
    %3 = vector.load %arg4[%c0_4, %c0_5] : memref<4x1xf32, #tpu.memory_space<vmem>>, vector<4x1xf32>
    %cst = arith.constant 0.000000e+00 : f32
    %4 = vector.broadcast %cst : f32 to vector<4x256xf32>
    %5 = vector.extract_strided_slice %2 {offsets = [0, 0], sizes = [4, 1], strides = [1, 1]} : vector<4x4xf32> to vector<4x1xf32>
    %6 = vector.extract_strided_slice %1 {offsets = [0, 0], sizes = [1, 256], strides = [1, 1]} : vector<4x256xf32> to vector<1x256xf32>
    %7 = vector.broadcast %5 : vector<4x1xf32> to vector<4x256xf32>
    %8 = vector.broadcast %6 : vector<1x256xf32> to vector<4x256xf32>
    %9 = arith.mulf %7, %8 : vector<4x256xf32>
    %10 = arith.addf %4, %9 : vector<4x256xf32>
    %11 = vector.extract_strided_slice %2 {offsets = [0, 1], sizes = [4, 1], strides = [1, 1]} : vector<4x4xf32> to vector<4x1xf32>
    %12 = vector.extract_strided_slice %1 {offsets = [1, 0], sizes = [1, 256], strides = [1, 1]} : vector<4x256xf32> to vector<1x256xf32>
    %13 = vector.broadcast %11 : vector<4x1xf32> to vector<4x256xf32>
    %14 = vector.broadcast %12 : vector<1x256xf32> to vector<4x256xf32>
    %15 = arith.mulf %13, %14 : vector<4x256xf32>
    %16 = arith.addf %10, %15 : vector<4x256xf32>
    %17 = vector.extract_strided_slice %2 {offsets = [0, 2], sizes = [4, 1], strides = [1, 1]} : vector<4x4xf32> to vector<4x1xf32>
    %18 = vector.extract_strided_slice %1 {offsets = [2, 0], sizes = [1, 256], strides = [1, 1]} : vector<4x256xf32> to vector<1x256xf32>
    %19 = vector.broadcast %17 : vector<4x1xf32> to vector<4x256xf32>
    %20 = vector.broadcast %18 : vector<1x256xf32> to vector<4x256xf32>
    %21 = arith.mulf %19, %20 : vector<4x256xf32>
    %22 = arith.addf %16, %21 : vector<4x256xf32>
    %23 = vector.extract_strided_slice %2 {offsets = [0, 3], sizes = [4, 1], strides = [1, 1]} : vector<4x4xf32> to vector<4x1xf32>
    %24 = vector.extract_strided_slice %1 {offsets = [3, 0], sizes = [1, 256], strides = [1, 1]} : vector<4x256xf32> to vector<1x256xf32>
    %25 = vector.broadcast %23 : vector<4x1xf32> to vector<4x256xf32>
    %26 = vector.broadcast %24 : vector<1x256xf32> to vector<4x256xf32>
    %27 = arith.mulf %25, %26 : vector<4x256xf32>
    %28 = arith.addf %22, %27 : vector<4x256xf32>
    %29 = vector.broadcast %3 : vector<4x1xf32> to vector<4x256xf32>
    %30 = arith.addf %28, %29 : vector<4x256xf32>
    %31 = arith.negf %30 : vector<4x256xf32>
    %32 = math.exp %31 : vector<4x256xf32>
    %cst_6 = arith.constant 1.000000e+00 : f32
    %33 = vector.broadcast %cst_6 : f32 to vector<4x256xf32>
    %34 = arith.addf %33, %32 : vector<4x256xf32>
    %35 = arith.divf %33, %34 : vector<4x256xf32>
    %36 = arith.mulf %1, %35 : vector<4x256xf32>
    %c0_7 = arith.constant 0 : index
    %c0_8 = arith.constant 0 : index
    %c0_9 = arith.constant 0 : index
    %37 = vector.load %arg5[%c0_7, %c0_8, %c0_9] : memref<1x4x256xf32, #tpu.memory_space<vmem>>, vector<1x4x256xf32>
    %38 = vector.shape_cast %37 : vector<1x4x256xf32> to vector<4x256xf32>
    %39 = vector.shape_cast %36 : vector<4x256xf32> to vector<1x4x256xf32>
    tpu.vector_store %arg5[%c0_7, %c0_8, %c0_9], %39 {strides = array<i32>} : memref<1x4x256xf32, #tpu.memory_space<vmem>>, vector<1x4x256xf32>,
    return
  }
  func.func @transform_0(%arg0: i32, %arg1: i32) -> (i32, i32, i32) {
    %c0_i32 = arith.constant 0 : i32
    %c0_i32_0 = arith.constant 0 : i32
    return %arg0, %c0_i32, %arg1 : i32, i32, i32
  }
  func.func @transform_1(%arg0: i32, %arg1: i32) -> (i32, i32) {
    %c0_i32 = arith.constant 0 : i32
    %c0_i32_0 = arith.constant 0 : i32
    %c0_i32_1 = arith.constant 0 : i32
    return %c0_i32, %c0_i32_0 : i32, i32
  }
  func.func @transform_2(%arg0: i32, %arg1: i32) -> (i32, i32) {
    %c0_i32 = arith.constant 0 : i32
    %c0_i32_0 = arith.constant 0 : i32
    %c0_i32_1 = arith.constant 0 : i32
    return %c0_i32, %c0_i32_0 : i32, i32
  }
  func.func @transform_3(%arg0: i32, %arg1: i32) -> (i32, i32, i32) {
    %c0_i32 = arith.constant 0 : i32
    %c0_i32_0 = arith.constant 0 : i32
    return %arg0, %c0_i32, %arg1 : i32, i32, i32
  }
}

</mosaic_0001>

<bundles_post_ra>
// kernel: tpu_custom_call.1
= control target key start
LH: loop header
LB: loop body
LE: loop exit
PB: predicated region body
PF: predicated region fallthrough
CT: control target
= control target key end

     0   :  { %8 = vsyncpa [#allocation3], 0  ;;  %s863_s0 = inlined_call_operand.hbm [shape: f32[2,4,256], index: 0, kind: input, shape index: {}]   ;;  %s864_s1 = inlined_call_operand.vmem [shape: f32[4,4], index: 1, kind: input, shape index: {}]   ;;  %s865_s2 = inlined_call_operand.vmem [shape: f32[4,1], index: 2, kind: input, shape index: {}]   ;;  %s866_s3 = inlined_call_operand.hbm [shape: f32[2,4,256], index: 3, kind: output, shape index: {}]  }
   0x1   :  { %10 = vsyncpa [#allocation3 + $0x1], 0 }
   0x2   :  { %11 = vsyncpa [#allocation4], 0 }
   0x3   :  { %13 = vsyncpa [#allocation4 + $0x1], 0  ;;  %s681_s12 = smov 0   ;;  %s683_s13 = smov 0  }
   0x4   :  { %s685_s14 = smov 0   ;;  %s687_s15 = smov 0  }
   0x5   :  { %s689_s16 = smov 0   ;;  %s691_s17 = smov 0  }
   0x6 LB: > { %s442_s18 = sadd.s32 4294967295, %s653_s17   ;;  %s443_s19 = sadd.s32 4294967294, %s653_s17   ;;  %s653_s17 = sphi %s691_s17, %s19_s17   ;;  %s649_s16 = sphi %s689_s16, %s882_s16   ;;  %s645_s15 = sphi %s687_s15, %s881_s15   ;;  %s641_s14 = sphi %s685_s14, %s880_s14   ;;  %s637_s13 = sphi %s683_s13, %s879_s13   ;;  %s633_s12 = sphi %s681_s12, %s878_s12  }
   0x7   : > { %s31_s20 = sadd.s32 1, %s649_s16  ;;  %s40_s21 = sadd.s32 1, %s641_s14 }
   0x8   : > { %p33_p0 = scmp.ge.s32.totalorder %s31_s20, 2  ;;  %p47_p1 = scmp.ne.s32.totalorder %s641_s14, %s637_s13 }
   0x9   : > { %p48_p2 = scmp.eq.s32.totalorder %s653_s17, 0  ;;  %p53_p3 = scmp.ne.s32.totalorder %s637_s13, %s633_s12 }
   0xa   : > { %s884_s20 = smov (%p33_p0, %s31_s20), 0  ;;  %p54_p5 = scmp.eq.s32.totalorder %s442_s18, 0 }
   0xb   : > { %p722_p4 = por %p48_p2, %p47_p1  ;;  %s35_s23 = ssub.s32 %s649_s16, %s884_s20 }
   0xc   : > { %p121_p6 = scmp.eq.s32.totalorder %s442_s18, 1  ;;  %p38_p7 = scmp.eq.s32.totalorder %s35_s23, 0 }
   0xd   : > { %p728_p8 = por %p54_p5, %p53_p3  ;;  %p127_p10 = scmp.eq.s32.totalorder %s443_s19, 1 }
   0xe   : > { %p732_p9 = por %p121_p6, %p47_p1  ;;  %p473_p13 = scmp.lt.s32.totalorder %s653_s17, 2 }
   0xf   : > { %s737_s26 = scalar_select %p38_p7, %s641_s14, %s40_s21  }
  0x10   : > { %s870_s25 = scalar_select %p732_p9, 1, 0 }
  0x11   : > { %p739_p11 = por %p127_p10, %p53_p3  ;;  %s153_s28 = sand.u32 1, %s641_s14  }
  0x12   : > { %s446_s29 = sshll.u32 %s153_s28, 3  ;;  %s459_s30 = sshll.u32 %s649_s16, 7 }
  0x13   : > { %s871_s27 = scalar_select %p739_p11, 1, 0 }
  0x14   : > { %s750_s6 = scalar_lea.hbm %s863_s0, %s459_s30  ;;  %s157_s7 = scalar_lea.vmem [#allocation2], %s446_s29 }
  0x15   : > { %s167_s8 = sshll.u32 %s157_s7, 4  ;;  %p756_p0 = pnand %p473_p13, %p722_p4  ;;  %s752_s8 = int_to_ptr.vmem [resolvable:$true] %s167_s8 }
  0x16   : > { %s154_s10 = scalar_lea.sflag [#allocation3], %s153_s28  ;;  %s541_s11 = scalar_lea.hbm %s750_s6, 128 }
  0x17   : > { %p542_p3 = scmp.ne.s32.totalorder %s750_s6, %s541_s11  ;;  %p543_p5 = pneg %p756_p0 }
  0x18   : > { %s546_s21 = scalar_lea.hbm %s863_s0, 256  ;;  %p547_p4 = scmp.lt.u32.totalorder %s750_s6, %s863_s0 }
  0x19   : > { %p544_p6 = pnand %p543_p5, %p542_p3  ;;  %p548_p10 = scmp.lt.u32.totalorder %s546_s21, %s541_s11 }
  0x1a   : > { %p550_p12 = scmp.lt.u32.totalorder %s541_s11, %s750_s6 }
  0x1b   : > { %p545_p7 = pneg %p544_p6  ;;  %p549_p13 = por %p548_p10, %p547_p4 }
  0x1d   : > { %p551_p1 = por %p550_p12, %p549_p13 }
  0x1f   : > { %p552_p2 = pnand %p551_p1, %p545_p7 }
  0x21   : > { %555 = shalt.err (!%p552_p2)
}
  0x22   : > { %s556_s28 = scalar_lea.vmem %s752_s8, 128  ;;  %s655_s29 = smov [#allocation2]  }
  0x23   : > { %p557_p3 = scmp.ne.s32.totalorder %s752_s8, %s556_s28  ;;  %s561_s30 = sshll.u32 %s655_s29, 4  ;;  %s562_s30 = int_to_ptr.vmem [resolvable:$false] %s561_s30 }
  0x24   : > { %s563_s4 = scalar_lea.vmem %s562_s30, 256  ;;  %p564_p9 = scmp.lt.s32.totalorder %s752_s8, %s562_s30 }
  0x25   : > { %p559_p6 = pnand %p557_p3, %p543_p5  ;;  %p565_p4 = scmp.lt.s32.totalorder %s563_s4, %s556_s28 }
  0x27   : > { %p560_p11 = pneg %p559_p6  ;;  %p566_p10 = por %p565_p4, %p564_p9 }
  0x29   : > { %p567_p12 = pnand %p566_p10, %p560_p11 }
  0x2b   : > { %570 = shalt.err (!%p567_p12)
}
  0x2c   : > { %468 = dma.hbm_to_vmem [thread:$0]  (!%p756_p0), %s750_s6, 128, %s752_s8, %s154_s10  }
  0x2d   : > { %p873_p1 = scmp.lt.s32.totalorder %s653_s17, 3  ;;  %p874_p2 = scmp.ge.s32.totalorder %s653_s17, 1 }
  0x2f   : > { %p173_p5 = pnand %p874_p2, %p873_p1 }
  0x30   : > { %s792_s5 = sand.u32 (!%p173_p5), 1, %s637_s13  }
  0x31   : > { %176 = sbr.rel (%p173_p5) target bundleno = 247 (0xf7), region = 32  ;;  %s450_s7 = sshll.u32 (!%p173_p5), %s792_s5, 3 }
  0x32   : > { %s179_s11 = scalar_lea.sflag (!%p173_p5), [#allocation3], %s792_s5  ;;  %s182_s9 = scalar_lea.vmem (!%p173_p5), [#allocation2], %s450_s7 }
  0x38   : > { %624 = dma.done.wait (%p728_p8), %s179_s11, 128  }
  0x39   : > { %626 = vsyncadd (%p728_p8), %s179_s11, 4294967168  ;;  %v656_v0 = vmov 0   ;;  %v657_v1 = vmov 2   ;;  %v208_v2 = vld [vmem:[%s864_s1] sm:$0xf]  ;;  %v658_v3 = vmov 1   ;;  %v216_v6 = vlaneseq }
  0x3a   : > { %527 = vset.pattern.permute.xlu0 %v656_v0  ;;  %529 = vset.pattern.permute.xlu1 %v657_v1  ;;  %v659_v4 = vmov 3   ;;  %v209_v5 = vld [vmem:[%s865_s2] sm:$0xf]  ;;  %s460_s24 = sshll.u32 %s645_s15, 7  ;;  %s204_s19 = scalar_lea.vmem [#allocation5], %s450_s7 }
  0x3b   : > { %212 = vperm.xlu0 %527, %v208_v2   ;;  %265 = vperm.xlu1 %529, %v208_v2   ;;  %v217_v7 = vshrl.u32 %v216_v6, 7  ;;  %v207_v12 = vld [vmem:[%s182_s9] sm:$0xff]  ;;  %s358_s21 = sshll.u32 %s204_s19, 4  ;;  %s814_s28 = scalar_lea.hbm %s866_s3, %s460_s24  ;;  %s816_s21 = int_to_ptr.vmem [resolvable:$true] %s358_s21 }
  0x3c   : > { %s342_s29 = scalar_lea.sflag [#allocation4], %s792_s5  ;;  %s571_s30 = scalar_lea.vmem %s816_s21, 128 }
  0x3d   : > { %v218_v8 = vsub.s32 0, %v217_v7  ;;  %v222_v9 = vsub.s32 4, %v217_v7  ;;  %v244_v10 = vsub.s32 1, %v217_v7  ;;  %v248_v11 = vsub.s32 5, %v217_v7  ;;  %p572_p8 = scmp.ne.s32.totalorder %s816_s21, %s571_s30  ;;  %p875_p9 = scmp.ne.s32.totalorder %s870_s25, 0 }
  0x3e   : > { %v270_v13 = vsub.s32 2, %v217_v7  ;;  %v274_v14 = vsub.s32 6, %v217_v7  ;;  %v296_v15 = vsub.s32 3, %v217_v7  ;;  %v300_v16 = vsub.s32 7, %v217_v7  ;;  %s660_s15 = smov [#allocation5]  }
  0x3f   : > { %528 = vset.pattern.permute.xlu0 %v658_v3  ;;  %530 = vset.pattern.permute.xlu1 %v659_v4  ;;  %v219_v17 = vrot.slane %v207_v12, %v218_v8  ;;  %v223_v18 = vrot.slane %v207_v12, %v222_v9  ;;  %v245_v19 = vrot.slane %v207_v12, %v244_v10  ;;  %p573_p11 = pnand %p572_p8, %p875_p9  ;;  %s575_s4 = sshll.u32 %s660_s15, 4  ;;  %s576_s4 = int_to_ptr.vmem [resolvable:$false] %s575_s4 }
  0x40   : > { %239 = vperm.xlu0 %528, %v208_v2   ;;  %291 = vperm.xlu1 %530, %v208_v2   ;;  %v249_v20 = vrot.slane %v207_v12, %v248_v11  ;;  %v271_v21 = vrot.slane %v207_v12, %v270_v13  ;;  %v275_v22 = vrot.slane %v207_v12, %v274_v14  ;;  %s577_s7 = scalar_lea.vmem %s576_s4, 256  ;;  %p578_p7 = scmp.lt.s32.totalorder %s816_s21, %s576_s4 }
  0x41   : > { %v297_v25 = vrot.slane %v207_v12, %v296_v15  ;;  %v301_v26 = vrot.slane %v207_v12, %v300_v16  ;;  %v229_v27 = vrot.slane %v219_v17, %v218_v8  ;;  %v233_v28 = vrot.slane %v223_v18, %v218_v8  ;;  %p574_p0 = pneg %p573_p11  ;;  %p579_p13 = scmp.lt.s32.totalorder %s577_s7, %s571_s30 }
  0x42   : > { %v255_v29 = vrot.slane %v245_v19, %v244_v10  ;;  %v259_v30 = vrot.slane %v249_v20, %v244_v10  ;;  %v281_v31 = vrot.slane %v271_v21, %v270_v13  ;;  %v285_v32 = vrot.slane %v275_v22, %v270_v13 }
  0x43   : > { %v307_v33 = vrot.slane %v297_v25, %v296_v15  ;;  %v311_v34 = vrot.slane %v301_v26, %v296_v15  ;;  %p580_p3 = por %p579_p13, %p578_p7 }
  0x44   : > { %531 = vset.pattern.permute.xlu1 %v656_v0  ;;  %532 = vset.pattern.permute.xlu0 %v656_v0 }
  0x45   : > { %318 = vperm.xlu1 %531, %v209_v5   ;;  %p581_p6 = pnand %p580_p3, %p574_p0 }
  0xba   : > { %v213_v23 = vpop.permute.xlu0 %212  ;;  %v266_v24 = vpop.permute.xlu1 %265 }
  0xbb   : > { %v234_v37 = vmul.f32 %v229_v27, %v213_v23  ;;  %v235_v38 = vmul.f32 %v233_v28, %v213_v23  ;;  %v286_v41 = vmul.f32 %v281_v31, %v266_v24  ;;  %v287_v42 = vmul.f32 %v285_v32, %v266_v24 }
  0xbf   : > { %v240_v35 = vpop.permute.xlu0 %239  ;;  %v292_v36 = vpop.permute.xlu1 %291 }
  0xc0   : > { %v260_v39 = vmul.f32 %v255_v29, %v240_v35  ;;  %v261_v40 = vmul.f32 %v259_v30, %v240_v35  ;;  %v312_v45 = vmul.f32 %v307_v33, %v292_v36  ;;  %v313_v46 = vmul.f32 %v311_v34, %v292_v36 }
  0xc2   : > { %v262_v43 = vadd.f32 %v260_v39, %v234_v37  ;;  %v263_v44 = vadd.f32 %v261_v40, %v235_v38 }
  0xc4   : > { %v288_v47 = vadd.f32 %v286_v41, %v262_v43  ;;  %v289_v48 = vadd.f32 %v287_v42, %v263_v44  ;;  %v319_v49 = vpop.permute.xlu1 %318 }
  0xc6   : > { %v314_v50 = vadd.f32 %v312_v45, %v288_v47  ;;  %v315_v51 = vadd.f32 %v313_v46, %v289_v48 }
  0xc8   : > { %v321_v52 = vadd.f32 %v319_v49, %v314_v50  ;;  %v322_v53 = vadd.f32 %v319_v49, %v315_v51 }
  0xca   : > { %v452_v54 = vmul.f32 -1.442695, %v321_v52  ;;  %v453_v55 = vmul.f32 -1.442695, %v322_v53 }
  0xcc   : > { %533 = vpow2.f32 %v452_v54 }
  0xcd   : > { %535 = vpow2.f32 %v453_v55 }
  0xd6   : > { %v534_v56 = vpop.eup %533 }
  0xd7   : > { %v536_v57 = vpop.eup %535  ;;  %v329_v58 = vadd.f32 1.0, %v534_v56 }
  0xd8   : > { %v330_v59 = vadd.f32 1.0, %v536_v57 }
  0xd9   : > { %537 = vrcp.f32 %v329_v58 }
  0xda   : > { %539 = vrcp.f32 %v330_v59 }
  0xe3   : > { %v538_v60 = vpop.eup %537 }
  0xe4   : > { %v540_v61 = vpop.eup %539 }
  0xe5   : > { %v337_v62 = vcombine.low %v538_v60, %v540_v61 }
  0xe7   : > { %v339_v63 = vmul.f32 %v337_v62, %v207_v12 }
  0xe9   : > { %340 = vst [vmem:[%s204_s19] sm:$0xff] %v339_v63 }
  0xea   : > { %584 = shalt.err (!%p581_p6)
}
  0xeb   : > { %s585_s5 = scalar_lea.hbm %s814_s28, 128  ;;  %s589_s6 = scalar_lea.hbm %s866_s3, 256 }
  0xec   : > { %p586_p4 = scmp.ne.s32.totalorder %s814_s28, %s585_s5  ;;  %p590_p1 = scmp.lt.u32.totalorder %s814_s28, %s866_s3 }
  0xed   : > { %p591_p2 = scmp.lt.u32.totalorder %s589_s6, %s585_s5  ;;  %p593_p8 = scmp.lt.u32.totalorder %s585_s5, %s814_s28 }
  0xee   : > { %p587_p10 = pnand %p586_p4, %p875_p9 }
  0xef   : > { %p592_p5 = por %p591_p2, %p590_p1 }
  0xf0   : > { %p588_p12 = pneg %p587_p10 }
  0xf1   : > { %p594_p11 = por %p593_p8, %p592_p5 }
  0xf3   : > { %p595_p0 = pnand %p594_p11, %p588_p12 }
  0xf5   : > { %598 = shalt.err (!%p595_p0)
}
  0xf6   : > { %463 = dma.vmem_to_hbm [thread:$0]  (%p875_p9), %s816_s21, 128, %s814_s28, %s342_s29  }
  0xf7 PF: > { %s370_s18 = sand.u32 1, %s633_s12   ;;  %p876_p7 = scmp.ne.s32.totalorder %s871_s27, 0 }
  0xf8   : > { %p877_p13 = scmp.ge.s32.totalorder %s653_s17, 2  ;;  %s371_s24 = scalar_lea.sflag [#allocation4], %s370_s18 }
  0xfa   : > { %p470_p3 = pnand %p877_p13, %p876_p7 }
  0xfc   : > { %628 = dma.done.wait (!%p470_p3), %s371_s24, 128  }
  0xfd   : > { %630 = vsyncadd (!%p470_p3), %s371_s24, 4294967168  ;;  %s19_s17 = sadd.s32 1, %s653_s17   ;;  %s878_s12 = smov %s637_s13 }
  0xfe   : > { %p16_p6 = scmp.ge.s32.totalorder %s19_s17, 4   ;;  %s879_s13 = smov %s641_s14 }
  0xff   : > { %s880_s14 = smov %s737_s26  ;;  %s881_s15 = smov %s649_s16 }
 0x100   : > { %s882_s16 = smov %s884_s20  ;;  %18 = sbr.rel (!%p16_p6) target bundleno = 6 (0x6), region = 77 }
 0x107   :  { %376 = vsyncpa [#allocation3], 1 }
 0x108   :  { %378 = vsyncpa [#allocation3 + $0x1], 1 }
 0x109   :  { %379 = vsyncpa [#allocation4], 1 }
 0x10a   :  { %381 = vsyncpa [#allocation4 + $0x1], 1 }

</bundles_post_ra>
